<compile_context>
chip_gen: v5e
topology: v5e:2x2
jax: 0.10.0
libtpu: 0.0.40
codegen_flags: <defaults>
</compile_context>

<pallas_src>
import math

import jax
import jax.numpy as jnp
from jax.experimental import pallas as pl
from jax.experimental.pallas import tpu as pltpu

EPS = 1e-5  # PyTorch BatchNorm1d default eps


# -----------------------------------------------------------------------------
# Kernel
# -----------------------------------------------------------------------------
def _make_kernel(TB, F, D, d_ff, fused_qkv, attn_bf16):
    def kernel(x_ref, *refs):
        if fused_qkv:
            (wqkv_ref, wo_ref, w1_ref, w1cs_ref, b1_ref,
             w2_ref, b2_ref, bn_ref, out_ref) = refs
        else:
            (wq_ref, wk_ref, wv_ref, wo_ref, w1_ref, w1cs_ref, b1_ref,
             w2_ref, b2_ref, bn_ref, out_ref) = refs

        x = x_ref[...].astype(jnp.float32)                 # (TB*F, D)
        xb = x.astype(jnp.bfloat16)

        # ---- QKV projections ------------------------------------------------
        if fused_qkv:
            # D % 128 == 0: one (D,3D) MXU weight, slices land on 128-lane tiles
            qkv = jnp.dot(xb, wqkv_ref[...], preferred_element_type=jnp.float32)
            q, k, v = qkv[:, 0 * D:1 * D], qkv[:, 1 * D:2 * D], qkv[:, 2 * D:3 * D]
        else:
            # D not lane-aligned: slicing a fused result would force relayouts,
            # so issue three dots sharing the same bf16 LHS instead.
            q = jnp.dot(xb, wq_ref[...], preferred_element_type=jnp.float32)
            k = jnp.dot(xb, wk_ref[...], preferred_element_type=jnp.float32)
            v = jnp.dot(xb, wv_ref[...], preferred_element_type=jnp.float32)

        adt = jnp.bfloat16 if attn_bf16 else jnp.float32
        q = q.astype(adt).reshape(TB, F, D)
        k = k.astype(adt).reshape(TB, F, D)
        v = v.astype(adt).reshape(TB, F, D)

        # ---- scores + softmax over d_feature axis (1/sqrt(D) folded into Wq) -
        s = jnp.einsum('bfd,bgd->bfg', q, k, preferred_element_type=jnp.float32)
        s = s - jnp.max(s, axis=-1, keepdims=True)
        p = jnp.exp(s)
        p = p * pl.reciprocal(jnp.sum(p, axis=-1, keepdims=True), approx=True)

        a = jnp.einsum('bfg,bgd->bfd', p.astype(adt), v,
                       preferred_element_type=jnp.float32)
        new_x = jnp.dot(a.reshape(TB * F, D).astype(jnp.bfloat16), wo_ref[...],
                        preferred_element_type=jnp.float32)

        # ---- residual (dropout == identity in eval) --------------------------
        x1 = x + new_x

        # ---- norm1 folded into conv1: z = sc1*(x1@w1) + sh1*colsum(w1) + b1 --
        # (avoids materializing the normalized (rows, D) temporary)
        sc1, sh1 = bn_ref[:, 0:1], bn_ref[:, 1:2]
        mm1 = jnp.dot(x1.astype(jnp.bfloat16), w1_ref[...],
                      preferred_element_type=jnp.float32)
        # For very large rows*d_ff, chunk d_ff with a short unrolled fori_loop
        # to bound f32 temporaries; unnecessary at these sizes.
        z = sc1 * mm1 + sh1 * w1cs_ref[...] + b1_ref[...]
        z = jnp.maximum(z, 0.0)                             # ReLU

        # ---- conv2 (1x1, d_ff -> D) ------------------------------------------
        y2 = jnp.dot(z.astype(jnp.bfloat16), w2_ref[...],
                     preferred_element_type=jnp.float32) + b2_ref[...]

        # ---- residual + norm2 (eval-mode BatchNorm affine) --------------------
        x2 = x1 + y2
        out_ref[...] = (x2 * bn_ref[:, 2:3] + bn_ref[:, 3:4]).astype(out_ref.dtype)

    return kernel


# -----------------------------------------------------------------------------
# Wrapper
# -----------------------------------------------------------------------------
def _pick_vmem_limit():
    # Per-generation scoped-VMEM sizing: 3/4 of physical, capped at 96 MiB.
    # -> 96 MiB on v5e/v6e (128 MiB parts), 48 MiB on v7x (64 MiB / TensorCore).
    try:
        cap = int(pltpu.get_tpu_info().vmem_capacity_bytes)
    except Exception:
        cap = 128 * 1024 * 1024
    return max(32 * 1024 * 1024, min(96 * 1024 * 1024, (cap * 3) // 4))


def iencoder_layer(x, params, *, tb=None, io_bf16=False):
    """x: [B, F, D] float32; params: dict of f32 weights (see init_params).

    io_bf16=True streams x/out as bf16 (halves HBM traffic of the only
    streaming tensors — useful on v5e) at slightly lower output precision.
    """
    B, F, D = x.shape
    d_ff = params["w1"].shape[1]
    io_dtype = jnp.bfloat16 if io_bf16 else jnp.float32
    itemsize = 2 if io_bf16 else 4

    vmem_limit = _pick_vmem_limit()

    def vmem_estimate(rows):
        stream = 2 * 2 * rows * D * itemsize           # x + out blocks, 2 buffers each
        weights = 2 * (4 * D * D + 2 * D * d_ff)        # bf16 matmul weights (1 buffer)
        weights += 4 * (2 * d_ff + D + 4 * rows)        # f32 biases / colsum / bn
        temps = 4 * rows * (8 * D + 2 * d_ff)           # f32 in-kernel temporaries
        return stream + weights + temps

    # ---- per-step batch tile: target 512-1024 rows, VMEM-budgeted -------------
    if tb is None:
        target_rows = 1024
        tb = max(1, min(B, target_rows // max(1, F)))
        budget = int(0.6 * vmem_limit)                  # headroom for Mosaic scratch
        while tb > 1 and vmem_estimate(tb * F) > budget:
            tb = max(1, tb // 2)
        steps = -(-B // tb)
        # keep streamed blocks sublane-aligned when there is more than one step
        if steps > 1 and (tb * F) % 8 != 0:
            mult = 8 // math.gcd(8, F)
            tb = -(-tb // mult) * mult
            steps = -(-B // tb)
        # prefer an even step count so a megacore split (v7x) gets balanced work
        if steps > 1 and steps % 2 == 1:
            for cand in range(tb, max(1, tb // 2) - 1, -1):
                if (cand * F) % 8 == 0 and (-(-B // cand)) % 2 == 0:
                    tb = cand
                    break
    steps = -(-B // tb)
    B_pad = steps * tb
    if B_pad != B:
        x = jnp.concatenate([x, jnp.zeros((B_pad - B, F, D), x.dtype)], axis=0)

    rows = tb * F
    x2d = x.reshape(B_pad * F, D).astype(io_dtype)

    # ---- pack weights (bf16 MXU operands; 1/sqrt(D) folded into Wq) ----------
    scale = 1.0 / math.sqrt(D)
    fused_qkv = (D % 128 == 0)
    attn_bf16 = (F >= 16) and (D % 128 == 0)

    wq_scaled = params["wq"] * scale
    if fused_qkv:
        qkv_weights = (jnp.concatenate(
            [wq_scaled, params["wk"], params["wv"]], axis=1).astype(jnp.bfloat16),)
    else:
        qkv_weights = (wq_scaled.astype(jnp.bfloat16),
                       params["wk"].astype(jnp.bfloat16),
                       params["wv"].astype(jnp.bfloat16))
    wo = params["wo"].astype(jnp.bfloat16)
    w1 = params["w1"].astype(jnp.bfloat16)
    w2 = params["w2"].astype(jnp.bfloat16)
    # norm1 is folded into conv1: z = sc1*(x1@w1) + sh1*colsum(w1) + b1
    w1cs = jnp.sum(params["w1"], axis=0, keepdims=True).astype(jnp.float32)  # (1, d_ff)
    b1 = params["b1"].astype(jnp.float32)
    b2 = params["b2"].astype(jnp.float32)

    # ---- BatchNorm eval-mode affine, packed into one small per-row array -----
    def affine(g, be, rm, rv):
        sc = g * jax.lax.rsqrt(rv + EPS)
        return sc, be - rm * sc
    sc1, sh1 = affine(params["g1"], params["be1"], params["rm1"], params["rv1"])
    sc2, sh2 = affine(params["g2"], params["be2"], params["rm2"], params["rv2"])
    bn = jnp.tile(jnp.concatenate([sc1, sh1, sc2, sh2], axis=1),
                  (tb, 1)).astype(jnp.float32)                              # (rows, 4)

    weights = (*qkv_weights, wo, w1, w1cs, b1, w2, b2, bn)
    kernel = _make_kernel(tb, F, D, d_ff, fused_qkv, attn_bf16)

    # Advisory cost estimate so XLA can schedule surrounding ops around the call.
    flops = (B_pad * F) * 2 * D * (4 * D + 2 * d_ff) + B_pad * 4 * F * F * D
    bytes_accessed = (2 * B_pad * F * D * itemsize
                      + sum(int(w.size) * w.dtype.itemsize for w in weights))
    cost = pl.CostEstimate(flops=int(flops),
                           transcendentals=int(B_pad * F * F),
                           bytes_accessed=int(bytes_accessed))

    def build(single_buffer_weights):
        def wspec(arr):
            nd = arr.ndim
            idx = lambda b, _nd=nd: (0,) * _nd
            if single_buffer_weights:
                # grid-invariant operand: one resident buffer, not the default two
                return pl.BlockSpec(arr.shape, idx, pipeline_mode=pl.Buffered(1))
            return pl.BlockSpec(arr.shape, idx)

        return pl.pallas_call(
            kernel,
            out_shape=jax.ShapeDtypeStruct((B_pad * F, D), io_dtype),
            grid_spec=pltpu.PrefetchScalarGridSpec(
                num_scalar_prefetch=0,
                grid=(steps,),
                in_specs=[pl.BlockSpec((rows, D), lambda b: (b, 0))]
                         + [wspec(w) for w in weights],
                out_specs=pl.BlockSpec((rows, D), lambda b: (b, 0)),
            ),
            compiler_params=pltpu.CompilerParams(
                dimension_semantics=("parallel",),
                vmem_limit_bytes=vmem_limit),
            cost_estimate=cost,
        )

    try:
        out2d = build(hasattr(pl, "Buffered"))(x2d, *weights)
    except Exception:
        # pipeline_mode / Buffered(1) unsupported on this jax version:
        # fall back to default (double-buffered) invariant operands.
        out2d = build(False)(x2d, *weights)

    return out2d.reshape(B_pad, F, D)[:B].astype(jnp.float32)


# -----------------------------------------------------------------------------
# Parameters + pure-JAX reference
# -----------------------------------------------------------------------------
def init_params(key, d_model, d_feature, d_ff):
    ks = jax.random.split(key, 16)
    n = lambda k, s, scale: (jax.random.normal(k, s, jnp.float32) * scale)
    sd = 1.0 / math.sqrt(d_model)
    sf = 1.0 / math.sqrt(d_ff)
    return {
        # attention projections
        "wq": n(ks[0], (d_model, d_model), sd),
        "wk": n(ks[1], (d_model, d_model), sd),
        "wv": n(ks[2], (d_model, d_model), sd),
        "wo": n(ks[3], (d_model, d_model), sd),
        # conv1: Conv1d(d_model, d_ff, 1)  -> stored transposed as [D, d_ff]
        "w1": n(ks[4], (d_model, d_ff), sd),
        "b1": n(ks[5], (1, d_ff), sd),
        # conv2: Conv1d(d_ff, d_model, 1)  -> stored transposed as [d_ff, D]
        "w2": n(ks[6], (d_ff, d_model), sf),
        "b2": n(ks[7], (1, d_model), sf),
        # norm1 (BatchNorm1d(d_feature)) eval-mode params, stored as [F, 1]
        "g1":  1.0 + n(ks[8],  (d_feature, 1), 0.1),
        "be1": n(ks[9],  (d_feature, 1), 0.1),
        "rm1": n(ks[10], (d_feature, 1), 0.1),
        "rv1": 1.0 + jnp.abs(n(ks[11], (d_feature, 1), 0.1)),
        # norm2
        "g2":  1.0 + n(ks[12], (d_feature, 1), 0.1),
        "be2": n(ks[13], (d_feature, 1), 0.1),
        "rm2": n(ks[14], (d_feature, 1), 0.1),
        "rv2": 1.0 + jnp.abs(n(ks[15], (d_feature, 1), 0.1)),
    }


def reference(x, p):
    """Pure-JAX f32 reference of the same forward pass (eval mode)."""
    d = x.shape[-1]
    q = x @ p["wq"]; k = x @ p["wk"]; v = x @ p["wv"]
    s = jnp.einsum("bfd,bgd->bfg", q, k) / math.sqrt(d)
    a = jax.nn.softmax(s, axis=-1)
    new_x = jnp.einsum("bfg,bgd->bfd", a, v) @ p["wo"]
    x1 = x + new_x
    bn = lambda t, g, be, rm, rv: (t - rm[None]) * jax.lax.rsqrt(rv[None] + EPS) * g[None] + be[None]
    y = bn(x1, p["g1"], p["be1"], p["rm1"], p["rv1"])
    z = jnp.maximum(y @ p["w1"] + p["b1"][None], 0.0)
    y2 = z @ p["w2"] + p["b2"][None]
    return bn(x1 + y2, p["g2"], p["be2"], p["rm2"], p["rv2"])


if __name__ == "__main__":
    key = jax.random.PRNGKey(0)
    kx, kp, kx2 = jax.random.split(key, 3)

    B, d_feature, d_model, d_ff = 2, 8, 32, 64
    x = jax.random.normal(kx, (B, d_feature, d_model), jnp.float32)
    params = init_params(kp, d_model, d_feature, d_ff)

    # Case 1: default tiling -> whole batch in one grid step (lane-dense store).
    out = jax.block_until_ready(iencoder_layer(x, params))
    ref = reference(x, params)
    assert out.shape == (B, d_feature, d_model)
    assert jnp.allclose(out, ref, atol=2e-2, rtol=2e-2), \
        f"max abs err {float(jnp.max(jnp.abs(out - ref)))}"

    # Case 2: forced small tile -> exercises batch padding + a multi-step grid
    # with the single-buffered invariant weights revisited across steps.
    B2 = 5
    x2 = jax.random.normal(kx2, (B2, d_feature, d_model), jnp.float32)
    out2 = jax.block_until_ready(iencoder_layer(x2, params, tb=2))
    ref2 = reference(x2, params)
    assert out2.shape == (B2, d_feature, d_model)
    assert jnp.allclose(out2, ref2, atol=2e-2, rtol=2e-2), \
        f"max abs err {float(jnp.max(jnp.abs(out2 - ref2)))}"

    print("KERNEL_OK")
</pallas_src>

<mosaic_0001>
module attributes {stable_mosaic.version = 11 : i64} {
  func.func @kernel(%arg0: i32, %arg1: memref<16x32xf32, #tpu.memory_space<vmem>>, %arg2: memref<32x32xbf16, #tpu.memory_space<vmem>>, %arg3: memref<32x32xbf16, #tpu.memory_space<vmem>>, %arg4: memref<32x32xbf16, #tpu.memory_space<vmem>>, %arg5: memref<32x32xbf16, #tpu.memory_space<vmem>>, %arg6: memref<32x64xbf16, #tpu.memory_space<vmem>>, %arg7: memref<1x64xf32, #tpu.memory_space<vmem>>, %arg8: memref<1x64xf32, #tpu.memory_space<vmem>>, %arg9: memref<64x32xbf16, #tpu.memory_space<vmem>>, %arg10: memref<1x32xf32, #tpu.memory_space<vmem>>, %arg11: memref<16x4xf32, #tpu.memory_space<vmem>>, %arg12: memref<16x32xf32, #tpu.memory_space<vmem>>) attributes {dimension_semantics = [#tpu.dimension_semantics<parallel>], iteration_bounds = array<i64: 1>, scalar_prefetch = 0 : i64, scratch_operands = 0 : i64, tpu.core_type = #tpu.core_type<tc>, window_params = [{transform_indices = @transform_0, window_bounds = array<i64: 16, 32>}, {pipeline_mode = #tpu.pipeline_mode<synchronous>, transform_indices = @transform_1, window_bounds = array<i64: 32, 32>}, {pipeline_mode = #tpu.pipeline_mode<synchronous>, transform_indices = @transform_2, window_bounds = array<i64: 32, 32>}, {pipeline_mode = #tpu.pipeline_mode<synchronous>, transform_indices = @transform_3, window_bounds = array<i64: 32, 32>}, {pipeline_mode = #tpu.pipeline_mode<synchronous>, transform_indices = @transform_4, window_bounds = array<i64: 32, 32>}, {pipeline_mode = #tpu.pipeline_mode<synchronous>, transform_indices = @transform_5, window_bounds = array<i64: 32, 64>}, {pipeline_mode = #tpu.pipeline_mode<synchronous>, transform_indices = @transform_6, window_bounds = array<i64: 1, 64>}, {pipeline_mode = #tpu.pipeline_mode<synchronous>, transform_indices = @transform_7, window_bounds = array<i64: 1, 64>}, {pipeline_mode = #tpu.pipeline_mode<synchronous>, transform_indices = @transform_8, window_bounds = array<i64: 64, 32>}, {pipeline_mode = #tpu.pipeline_mode<synchronous>, transform_indices = @transform_9, window_bounds = array<i64: 1, 32>}, {pipeline_mode = #tpu.pipeline_mode<synchronous>, transform_indices = @transform_10, window_bounds = array<i64: 16, 4>}, {transform_indices = @transform_11, window_bounds = array<i64: 16, 32>}]} {
    %c0 = arith.constant 0 : index
    %c0_0 = arith.constant 0 : index
    %0 = vector.load %arg1[%c0, %c0_0] : memref<16x32xf32, #tpu.memory_space<vmem>>, vector<16x32xf32>
    %1 = arith.truncf %0 : vector<16x32xf32> to vector<16x32xbf16>
    %c0_1 = arith.constant 0 : index
    %c0_2 = arith.constant 0 : index
    %2 = vector.load %arg2[%c0_1, %c0_2] : memref<32x32xbf16, #tpu.memory_space<vmem>>, vector<32x32xbf16>
    %cst = arith.constant dense<0.000000e+00> : vector<16x32xf32>
    %3 = tpu.matmul %1, %2, %cst {dimension_numbers = #tpu.dot_dimension_numbers<[1], [0], [0], [1], [0, 0, 1, 1], [], []>} : vector<16x32xbf16>, vector<32x32xbf16>, vector<16x32xf32> -> vector<16x32xf32>
    %c0_3 = arith.constant 0 : index
    %c0_4 = arith.constant 0 : index
    %4 = vector.load %arg3[%c0_3, %c0_4] : memref<32x32xbf16, #tpu.memory_space<vmem>>, vector<32x32xbf16>
    %cst_5 = arith.constant dense<0.000000e+00> : vector<16x32xf32>
    %5 = tpu.matmul %1, %4, %cst_5 {dimension_numbers = #tpu.dot_dimension_numbers<[1], [0], [0], [1], [0, 0, 1, 1], [], []>} : vector<16x32xbf16>, vector<32x32xbf16>, vector<16x32xf32> -> vector<16x32xf32>
    %c0_6 = arith.constant 0 : index
    %c0_7 = arith.constant 0 : index
    %6 = vector.load %arg4[%c0_6, %c0_7] : memref<32x32xbf16, #tpu.memory_space<vmem>>, vector<32x32xbf16>
    %cst_8 = arith.constant dense<0.000000e+00> : vector<16x32xf32>
    %7 = tpu.matmul %1, %6, %cst_8 {dimension_numbers = #tpu.dot_dimension_numbers<[1], [0], [0], [1], [0, 0, 1, 1], [], []>} : vector<16x32xbf16>, vector<32x32xbf16>, vector<16x32xf32> -> vector<16x32xf32>
    %8 = vector.shape_cast %3 : vector<16x32xf32> to vector<2x8x32xf32>
    %9 = vector.shape_cast %5 : vector<16x32xf32> to vector<2x8x32xf32>
    %10 = vector.shape_cast %7 : vector<16x32xf32> to vector<2x8x32xf32>
    "tpu.trace_start"() <{level = 10 : i32, message = "bfd,bgd->bfg"}> : () -> ()
    %cst_9 = arith.constant dense<0.000000e+00> : vector<2x8x8xf32>
    %11 = tpu.matmul %8, %9, %cst_9 {dimension_numbers = #tpu.dot_dimension_numbers<[2], [2], [1], [1], [0, 0, 0, 1, 1, 1], [0], [0]>} : vector<2x8x32xf32>, vector<2x8x32xf32>, vector<2x8x8xf32> -> vector<2x8x8xf32>
    "tpu.trace_stop"() : () -> ()
    %cst_10 = arith.constant dense<0xFF800000> : vector<2x8xf32>
    %12 = vector.multi_reduction <maximumf>, %11, %cst_10 [2] : vector<2x8x8xf32> to vector<2x8xf32>
    %13 = vector.shape_cast %12 : vector<2x8xf32> to vector<2x8x1xf32>
    %14 = vector.broadcast %13 : vector<2x8x1xf32> to vector<2x8x8xf32>
    %15 = arith.subf %11, %14 : vector<2x8x8xf32>
    %16 = math.exp %15 : vector<2x8x8xf32>
    %cst_11 = arith.constant dense<0.000000e+00> : vector<2x8xf32>
    %17 = vector.multi_reduction <add>, %16, %cst_11 [2] : vector<2x8x8xf32> to vector<2x8xf32>
    %18 = vector.shape_cast %17 : vector<2x8xf32> to vector<2x8x1xf32>
    %19 = tpu.reciprocal %18 {approx = true} : vector<2x8x1xf32> -> vector<2x8x1xf32>
    %20 = vector.broadcast %19 : vector<2x8x1xf32> to vector<2x8x8xf32>
    %21 = arith.mulf %16, %20 : vector<2x8x8xf32>
    "tpu.trace_start"() <{level = 10 : i32, message = "bfg,bgd->bfd"}> : () -> ()
    %cst_12 = arith.constant dense<0.000000e+00> : vector<2x8x32xf32>
    %22 = tpu.matmul %21, %10, %cst_12 {dimension_numbers = #tpu.dot_dimension_numbers<[2], [1], [1], [2], [0, 0, 0, 1, 1, 2], [0], [0]>} : vector<2x8x8xf32>, vector<2x8x32xf32>, vector<2x8x32xf32> -> vector<2x8x32xf32>
    "tpu.trace_stop"() : () -> ()
    %23 = vector.shape_cast %22 : vector<2x8x32xf32> to vector<16x32xf32>
    %24 = arith.truncf %23 : vector<16x32xf32> to vector<16x32xbf16>
    %c0_13 = arith.constant 0 : index
    %c0_14 = arith.constant 0 : index
    %25 = vector.load %arg5[%c0_13, %c0_14] : memref<32x32xbf16, #tpu.memory_space<vmem>>, vector<32x32xbf16>
    %cst_15 = arith.constant dense<0.000000e+00> : vector<16x32xf32>
    %26 = tpu.matmul %24, %25, %cst_15 {dimension_numbers = #tpu.dot_dimension_numbers<[1], [0], [0], [1], [0, 0, 1, 1], [], []>} : vector<16x32xbf16>, vector<32x32xbf16>, vector<16x32xf32> -> vector<16x32xf32>
    %27 = arith.addf %0, %26 : vector<16x32xf32>
    %c0_16 = arith.constant 0 : index
    %c0_17 = arith.constant 0 : index
    %28 = vector.load %arg11[%c0_16, %c0_17] : memref<16x4xf32, #tpu.memory_space<vmem>>, vector<16x1xf32>
    %c0_18 = arith.constant 0 : index
    %c1 = arith.constant 1 : index
    %29 = vector.load %arg11[%c0_18, %c1] : memref<16x4xf32, #tpu.memory_space<vmem>>, vector<16x1xf32>
    %30 = arith.truncf %27 : vector<16x32xf32> to vector<16x32xbf16>
    %c0_19 = arith.constant 0 : index
    %c0_20 = arith.constant 0 : index
    %31 = vector.load %arg6[%c0_19, %c0_20] : memref<32x64xbf16, #tpu.memory_space<vmem>>, vector<32x64xbf16>
    %cst_21 = arith.constant dense<0.000000e+00> : vector<16x64xf32>
    %32 = tpu.matmul %30, %31, %cst_21 {dimension_numbers = #tpu.dot_dimension_numbers<[1], [0], [0], [1], [0, 0, 1, 1], [], []>} : vector<16x32xbf16>, vector<32x64xbf16>, vector<16x64xf32> -> vector<16x64xf32>
    %33 = vector.broadcast %28 : vector<16x1xf32> to vector<16x64xf32>
    %34 = arith.mulf %33, %32 : vector<16x64xf32>
    %c0_22 = arith.constant 0 : index
    %c0_23 = arith.constant 0 : index
    %35 = vector.load %arg7[%c0_22, %c0_23] : memref<1x64xf32, #tpu.memory_space<vmem>>, vector<1x64xf32>
    %36 = vector.broadcast %29 : vector<16x1xf32> to vector<16x64xf32>
    %37 = vector.broadcast %35 : vector<1x64xf32> to vector<16x64xf32>
    %38 = arith.mulf %36, %37 : vector<16x64xf32>
    %39 = arith.addf %34, %38 : vector<16x64xf32>
    %c0_24 = arith.constant 0 : index
    %c0_25 = arith.constant 0 : index
    %40 = vector.load %arg8[%c0_24, %c0_25] : memref<1x64xf32, #tpu.memory_space<vmem>>, vector<1x64xf32>
    %41 = vector.broadcast %40 : vector<1x64xf32> to vector<16x64xf32>
    %42 = arith.addf %39, %41 : vector<16x64xf32>
    %cst_26 = arith.constant 0.000000e+00 : f32
    %43 = vector.broadcast %cst_26 : f32 to vector<16x64xf32>
    %44 = arith.maximumf %42, %43 : vector<16x64xf32>
    %45 = arith.truncf %44 : vector<16x64xf32> to vector<16x64xbf16>
    %c0_27 = arith.constant 0 : index
    %c0_28 = arith.constant 0 : index
    %46 = vector.load %arg9[%c0_27, %c0_28] : memref<64x32xbf16, #tpu.memory_space<vmem>>, vector<64x32xbf16>
    %cst_29 = arith.constant dense<0.000000e+00> : vector<16x32xf32>
    %47 = tpu.matmul %45, %46, %cst_29 {dimension_numbers = #tpu.dot_dimension_numbers<[1], [0], [0], [1], [0, 0, 1, 1], [], []>} : vector<16x64xbf16>, vector<64x32xbf16>, vector<16x32xf32> -> vector<16x32xf32>
    %c0_30 = arith.constant 0 : index
    %c0_31 = arith.constant 0 : index
    %48 = vector.load %arg10[%c0_30, %c0_31] : memref<1x32xf32, #tpu.memory_space<vmem>>, vector<1x32xf32>
    %49 = vector.broadcast %48 : vector<1x32xf32> to vector<16x32xf32>
    %50 = arith.addf %47, %49 : vector<16x32xf32>
    %51 = arith.addf %27, %50 : vector<16x32xf32>
    %c0_32 = arith.constant 0 : index
    %c2 = arith.constant 2 : index
    %52 = vector.load %arg11[%c0_32, %c2] : memref<16x4xf32, #tpu.memory_space<vmem>>, vector<16x1xf32>
    %53 = vector.broadcast %52 : vector<16x1xf32> to vector<16x32xf32>
    %54 = arith.mulf %51, %53 : vector<16x32xf32>
    %c0_33 = arith.constant 0 : index
    %c3 = arith.constant 3 : index
    %55 = vector.load %arg11[%c0_33, %c3] : memref<16x4xf32, #tpu.memory_space<vmem>>, vector<16x1xf32>
    %56 = vector.broadcast %55 : vector<16x1xf32> to vector<16x32xf32>
    %57 = arith.addf %54, %56 : vector<16x32xf32>
    %c0_34 = arith.constant 0 : index
    %c0_35 = arith.constant 0 : index
    %58 = vector.load %arg12[%c0_34, %c0_35] : memref<16x32xf32, #tpu.memory_space<vmem>>, vector<16x32xf32>
    tpu.vector_store %arg12[%c0_34, %c0_35], %57 {strides = array<i32>} : memref<16x32xf32, #tpu.memory_space<vmem>>, vector<16x32xf32>,
    return
  }
  func.func @transform_0(%arg0: i32) -> (i32, i32) {
    %c0_i32 = arith.constant 0 : i32
    %c0_i32_0 = arith.constant 0 : i32
    return %arg0, %c0_i32 : i32, i32
  }
  func.func @transform_1(%arg0: i32) -> (i32, i32) {
    %c0_i32 = arith.constant 0 : i32
    %c0_i32_0 = arith.constant 0 : i32
    %c0_i32_1 = arith.constant 0 : i32
    return %c0_i32, %c0_i32_0 : i32, i32
  }
  func.func @transform_2(%arg0: i32) -> (i32, i32) {
    %c0_i32 = arith.constant 0 : i32
    %c0_i32_0 = arith.constant 0 : i32
    %c0_i32_1 = arith.constant 0 : i32
    return %c0_i32, %c0_i32_0 : i32, i32
  }
  func.func @transform_3(%arg0: i32) -> (i32, i32) {
    %c0_i32 = arith.constant 0 : i32
    %c0_i32_0 = arith.constant 0 : i32
    %c0_i32_1 = arith.constant 0 : i32
    return %c0_i32, %c0_i32_0 : i32, i32
  }
  func.func @transform_4(%arg0: i32) -> (i32, i32) {
    %c0_i32 = arith.constant 0 : i32
    %c0_i32_0 = arith.constant 0 : i32
    %c0_i32_1 = arith.constant 0 : i32
    return %c0_i32, %c0_i32_0 : i32, i32
  }
  func.func @transform_5(%arg0: i32) -> (i32, i32) {
    %c0_i32 = arith.constant 0 : i32
    %c0_i32_0 = arith.constant 0 : i32
    %c0_i32_1 = arith.constant 0 : i32
    return %c0_i32, %c0_i32_0 : i32, i32
  }
  func.func @transform_6(%arg0: i32) -> (i32, i32) {
    %c0_i32 = arith.constant 0 : i32
    %c0_i32_0 = arith.constant 0 : i32
    %c0_i32_1 = arith.constant 0 : i32
    return %c0_i32, %c0_i32_0 : i32, i32
  }
  func.func @transform_7(%arg0: i32) -> (i32, i32) {
    %c0_i32 = arith.constant 0 : i32
    %c0_i32_0 = arith.constant 0 : i32
    %c0_i32_1 = arith.constant 0 : i32
    return %c0_i32, %c0_i32_0 : i32, i32
  }
  func.func @transform_8(%arg0: i32) -> (i32, i32) {
    %c0_i32 = arith.constant 0 : i32
    %c0_i32_0 = arith.constant 0 : i32
    %c0_i32_1 = arith.constant 0 : i32
    return %c0_i32, %c0_i32_0 : i32, i32
  }
  func.func @transform_9(%arg0: i32) -> (i32, i32) {
    %c0_i32 = arith.constant 0 : i32
    %c0_i32_0 = arith.constant 0 : i32
    %c0_i32_1 = arith.constant 0 : i32
    return %c0_i32, %c0_i32_0 : i32, i32
  }
  func.func @transform_10(%arg0: i32) -> (i32, i32) {
    %c0_i32 = arith.constant 0 : i32
    %c0_i32_0 = arith.constant 0 : i32
    %c0_i32_1 = arith.constant 0 : i32
    return %c0_i32, %c0_i32_0 : i32, i32
  }
  func.func @transform_11(%arg0: i32) -> (i32, i32) {
    %c0_i32 = arith.constant 0 : i32
    %c0_i32_0 = arith.constant 0 : i32
    return %arg0, %c0_i32 : i32, i32
  }
}

module attributes {stable_mosaic.version = 11 : i64} {
  func.func @kernel(%arg0: i32, %arg1: memref<16x32xf32, #tpu.memory_space<vmem>>, %arg2: memref<32x32xbf16, #tpu.memory_space<vmem>>, %arg3: memref<32x32xbf16, #tpu.memory_space<vmem>>, %arg4: memref<32x32xbf16, #tpu.memory_space<vmem>>, %arg5: memref<32x32xbf16, #tpu.memory_space<vmem>>, %arg6: memref<32x64xbf16, #tpu.memory_space<vmem>>, %arg7: memref<1x64xf32, #tpu.memory_space<vmem>>, %arg8: memref<1x64xf32, #tpu.memory_space<vmem>>, %arg9: memref<64x32xbf16, #tpu.memory_space<vmem>>, %arg10: memref<1x32xf32, #tpu.memory_space<vmem>>, %arg11: memref<16x4xf32, #tpu.memory_space<vmem>>, %arg12: memref<16x32xf32, #tpu.memory_space<vmem>>) attributes {dimension_semantics = [#tpu.dimension_semantics<parallel>], iteration_bounds = array<i64: 1>, scalar_prefetch = 0 : i64, scratch_operands = 0 : i64, tpu.core_type = #tpu.core_type<tc>, window_params = [{transform_indices = @transform_0, window_bounds = array<i64: 16, 32>}, {pipeline_mode = #tpu.pipeline_mode<synchronous>, transform_indices = @transform_1, window_bounds = array<i64: 32, 32>}, {pipeline_mode = #tpu.pipeline_mode<synchronous>, transform_indices = @transform_2, window_bounds = array<i64: 32, 32>}, {pipeline_mode = #tpu.pipeline_mode<synchronous>, transform_indices = @transform_3, window_bounds = array<i64: 32, 32>}, {pipeline_mode = #tpu.pipeline_mode<synchronous>, transform_indices = @transform_4, window_bounds = array<i64: 32, 32>}, {pipeline_mode = #tpu.pipeline_mode<synchronous>, transform_indices = @transform_5, window_bounds = array<i64: 32, 64>}, {pipeline_mode = #tpu.pipeline_mode<synchronous>, transform_indices = @transform_6, window_bounds = array<i64: 1, 64>}, {pipeline_mode = #tpu.pipeline_mode<synchronous>, transform_indices = @transform_7, window_bounds = array<i64: 1, 64>}, {pipeline_mode = #tpu.pipeline_mode<synchronous>, transform_indices = @transform_8, window_bounds = array<i64: 64, 32>}, {pipeline_mode = #tpu.pipeline_mode<synchronous>, transform_indices = @transform_9, window_bounds = array<i64: 1, 32>}, {pipeline_mode = #tpu.pipeline_mode<synchronous>, transform_indices = @transform_10, window_bounds = array<i64: 16, 4>}, {transform_indices = @transform_11, window_bounds = array<i64: 16, 32>}]} {
    %c0 = arith.constant 0 : index
    %c0_0 = arith.constant 0 : index
    %0 = vector.load %arg1[%c0, %c0_0] : memref<16x32xf32, #tpu.memory_space<vmem>>, vector<16x32xf32>
    %1 = arith.truncf %0 : vector<16x32xf32> to vector<16x32xbf16>
    %c0_1 = arith.constant 0 : index
    %c0_2 = arith.constant 0 : index
    %2 = vector.load %arg2[%c0_1, %c0_2] : memref<32x32xbf16, #tpu.memory_space<vmem>>, vector<32x32xbf16>
    %cst = arith.constant dense<0.000000e+00> : vector<16x32xf32>
    %3 = tpu.matmul %1, %2, %cst {dimension_numbers = #tpu.dot_dimension_numbers<[1], [0], [0], [1], [0, 0, 1, 1], [], []>} : vector<16x32xbf16>, vector<32x32xbf16>, vector<16x32xf32> -> vector<16x32xf32>
    %c0_3 = arith.constant 0 : index
    %c0_4 = arith.constant 0 : index
    %4 = vector.load %arg3[%c0_3, %c0_4] : memref<32x32xbf16, #tpu.memory_space<vmem>>, vector<32x32xbf16>
    %cst_5 = arith.constant dense<0.000000e+00> : vector<16x32xf32>
    %5 = tpu.matmul %1, %4, %cst_5 {dimension_numbers = #tpu.dot_dimension_numbers<[1], [0], [0], [1], [0, 0, 1, 1], [], []>} : vector<16x32xbf16>, vector<32x32xbf16>, vector<16x32xf32> -> vector<16x32xf32>
    %c0_6 = arith.constant 0 : index
    %c0_7 = arith.constant 0 : index
    %6 = vector.load %arg4[%c0_6, %c0_7] : memref<32x32xbf16, #tpu.memory_space<vmem>>, vector<32x32xbf16>
    %cst_8 = arith.constant dense<0.000000e+00> : vector<16x32xf32>
    %7 = tpu.matmul %1, %6, %cst_8 {dimension_numbers = #tpu.dot_dimension_numbers<[1], [0], [0], [1], [0, 0, 1, 1], [], []>} : vector<16x32xbf16>, vector<32x32xbf16>, vector<16x32xf32> -> vector<16x32xf32>
    %8 = vector.shape_cast %3 : vector<16x32xf32> to vector<2x8x32xf32>
    %9 = vector.shape_cast %5 : vector<16x32xf32> to vector<2x8x32xf32>
    %10 = vector.shape_cast %7 : vector<16x32xf32> to vector<2x8x32xf32>
    "tpu.trace_start"() <{level = 10 : i32, message = "bfd,bgd->bfg"}> : () -> ()
    %cst_9 = arith.constant dense<0.000000e+00> : vector<2x8x8xf32>
    %11 = tpu.matmul %8, %9, %cst_9 {dimension_numbers = #tpu.dot_dimension_numbers<[2], [2], [1], [1], [0, 0, 0, 1, 1, 1], [0], [0]>} : vector<2x8x32xf32>, vector<2x8x32xf32>, vector<2x8x8xf32> -> vector<2x8x8xf32>
    "tpu.trace_stop"() : () -> ()
    %cst_10 = arith.constant dense<0xFF800000> : vector<2x8xf32>
    %12 = vector.multi_reduction <maximumf>, %11, %cst_10 [2] : vector<2x8x8xf32> to vector<2x8xf32>
    %13 = vector.shape_cast %12 : vector<2x8xf32> to vector<2x8x1xf32>
    %14 = vector.broadcast %13 : vector<2x8x1xf32> to vector<2x8x8xf32>
    %15 = arith.subf %11, %14 : vector<2x8x8xf32>
    %16 = math.exp %15 : vector<2x8x8xf32>
    %cst_11 = arith.constant dense<0.000000e+00> : vector<2x8xf32>
    %17 = vector.multi_reduction <add>, %16, %cst_11 [2] : vector<2x8x8xf32> to vector<2x8xf32>
    %18 = vector.shape_cast %17 : vector<2x8xf32> to vector<2x8x1xf32>
    %19 = tpu.reciprocal %18 {approx = true} : vector<2x8x1xf32> -> vector<2x8x1xf32>
    %20 = vector.broadcast %19 : vector<2x8x1xf32> to vector<2x8x8xf32>
    %21 = arith.mulf %16, %20 : vector<2x8x8xf32>
    "tpu.trace_start"() <{level = 10 : i32, message = "bfg,bgd->bfd"}> : () -> ()
    %cst_12 = arith.constant dense<0.000000e+00> : vector<2x8x32xf32>
    %22 = tpu.matmul %21, %10, %cst_12 {dimension_numbers = #tpu.dot_dimension_numbers<[2], [1], [1], [2], [0, 0, 0, 1, 1, 2], [0], [0]>} : vector<2x8x8xf32>, vector<2x8x32xf32>, vector<2x8x32xf32> -> vector<2x8x32xf32>
    "tpu.trace_stop"() : () -> ()
    %23 = vector.shape_cast %22 : vector<2x8x32xf32> to vector<16x32xf32>
    %24 = arith.truncf %23 : vector<16x32xf32> to vector<16x32xbf16>
    %c0_13 = arith.constant 0 : index
    %c0_14 = arith.constant 0 : index
    %25 = vector.load %arg5[%c0_13, %c0_14] : memref<32x32xbf16, #tpu.memory_space<vmem>>, vector<32x32xbf16>
    %cst_15 = arith.constant dense<0.000000e+00> : vector<16x32xf32>
    %26 = tpu.matmul %24, %25, %cst_15 {dimension_numbers = #tpu.dot_dimension_numbers<[1], [0], [0], [1], [0, 0, 1, 1], [], []>} : vector<16x32xbf16>, vector<32x32xbf16>, vector<16x32xf32> -> vector<16x32xf32>
    %27 = arith.addf %0, %26 : vector<16x32xf32>
    %c0_16 = arith.constant 0 : index
    %c0_17 = arith.constant 0 : index
    %28 = vector.load %arg11[%c0_16, %c0_17] : memref<16x4xf32, #tpu.memory_space<vmem>>, vector<16x1xf32>
    %c0_18 = arith.constant 0 : index
    %c1 = arith.constant 1 : index
    %29 = vector.load %arg11[%c0_18, %c1] : memref<16x4xf32, #tpu.memory_space<vmem>>, vector<16x1xf32>
    %30 = arith.truncf %27 : vector<16x32xf32> to vector<16x32xbf16>
    %c0_19 = arith.constant 0 : index
    %c0_20 = arith.constant 0 : index
    %31 = vector.load %arg6[%c0_19, %c0_20] : memref<32x64xbf16, #tpu.memory_space<vmem>>, vector<32x64xbf16>
    %cst_21 = arith.constant dense<0.000000e+00> : vector<16x64xf32>
    %32 = tpu.matmul %30, %31, %cst_21 {dimension_numbers = #tpu.dot_dimension_numbers<[1], [0], [0], [1], [0, 0, 1, 1], [], []>} : vector<16x32xbf16>, vector<32x64xbf16>, vector<16x64xf32> -> vector<16x64xf32>
    %33 = vector.broadcast %28 : vector<16x1xf32> to vector<16x64xf32>
    %34 = arith.mulf %33, %32 : vector<16x64xf32>
    %c0_22 = arith.constant 0 : index
    %c0_23 = arith.constant 0 : index
    %35 = vector.load %arg7[%c0_22, %c0_23] : memref<1x64xf32, #tpu.memory_space<vmem>>, vector<1x64xf32>
    %36 = vector.broadcast %29 : vector<16x1xf32> to vector<16x64xf32>
    %37 = vector.broadcast %35 : vector<1x64xf32> to vector<16x64xf32>
    %38 = arith.mulf %36, %37 : vector<16x64xf32>
    %39 = arith.addf %34, %38 : vector<16x64xf32>
    %c0_24 = arith.constant 0 : index
    %c0_25 = arith.constant 0 : index
    %40 = vector.load %arg8[%c0_24, %c0_25] : memref<1x64xf32, #tpu.memory_space<vmem>>, vector<1x64xf32>
    %41 = vector.broadcast %40 : vector<1x64xf32> to vector<16x64xf32>
    %42 = arith.addf %39, %41 : vector<16x64xf32>
    %cst_26 = arith.constant 0.000000e+00 : f32
    %43 = vector.broadcast %cst_26 : f32 to vector<16x64xf32>
    %44 = arith.maximumf %42, %43 : vector<16x64xf32>
    %45 = arith.truncf %44 : vector<16x64xf32> to vector<16x64xbf16>
    %c0_27 = arith.constant 0 : index
    %c0_28 = arith.constant 0 : index
    %46 = vector.load %arg9[%c0_27, %c0_28] : memref<64x32xbf16, #tpu.memory_space<vmem>>, vector<64x32xbf16>
    %cst_29 = arith.constant dense<0.000000e+00> : vector<16x32xf32>
    %47 = tpu.matmul %45, %46, %cst_29 {dimension_numbers = #tpu.dot_dimension_numbers<[1], [0], [0], [1], [0, 0, 1, 1], [], []>} : vector<16x64xbf16>, vector<64x32xbf16>, vector<16x32xf32> -> vector<16x32xf32>
    %c0_30 = arith.constant 0 : index
    %c0_31 = arith.constant 0 : index
    %48 = vector.load %arg10[%c0_30, %c0_31] : memref<1x32xf32, #tpu.memory_space<vmem>>, vector<1x32xf32>
    %49 = vector.broadcast %48 : vector<1x32xf32> to vector<16x32xf32>
    %50 = arith.addf %47, %49 : vector<16x32xf32>
    %51 = arith.addf %27, %50 : vector<16x32xf32>
    %c0_32 = arith.constant 0 : index
    %c2 = arith.constant 2 : index
    %52 = vector.load %arg11[%c0_32, %c2] : memref<16x4xf32, #tpu.memory_space<vmem>>, vector<16x1xf32>
    %53 = vector.broadcast %52 : vector<16x1xf32> to vector<16x32xf32>
    %54 = arith.mulf %51, %53 : vector<16x32xf32>
    %c0_33 = arith.constant 0 : index
    %c3 = arith.constant 3 : index
    %55 = vector.load %arg11[%c0_33, %c3] : memref<16x4xf32, #tpu.memory_space<vmem>>, vector<16x1xf32>
    %56 = vector.broadcast %55 : vector<16x1xf32> to vector<16x32xf32>
    %57 = arith.addf %54, %56 : vector<16x32xf32>
    %c0_34 = arith.constant 0 : index
    %c0_35 = arith.constant 0 : index
    %58 = vector.load %arg12[%c0_34, %c0_35] : memref<16x32xf32, #tpu.memory_space<vmem>>, vector<16x32xf32>
    tpu.vector_store %arg12[%c0_34, %c0_35], %57 {strides = array<i32>} : memref<16x32xf32, #tpu.memory_space<vmem>>, vector<16x32xf32>,
    return
  }
  func.func @transform_0(%arg0: i32) -> (i32, i32) {
    %c0_i32 = arith.constant 0 : i32
    %c0_i32_0 = arith.constant 0 : i32
    return %arg0, %c0_i32 : i32, i32
  }
  func.func @transform_1(%arg0: i32) -> (i32, i32) {
    %c0_i32 = arith.constant 0 : i32
    %c0_i32_0 = arith.constant 0 : i32
    %c0_i32_1 = arith.constant 0 : i32
    return %c0_i32, %c0_i32_0 : i32, i32
  }
  func.func @transform_2(%arg0: i32) -> (i32, i32) {
    %c0_i32 = arith.constant 0 : i32
    %c0_i32_0 = arith.constant 0 : i32
    %c0_i32_1 = arith.constant 0 : i32
    return %c0_i32, %c0_i32_0 : i32, i32
  }
  func.func @transform_3(%arg0: i32) -> (i32, i32) {
    %c0_i32 = arith.constant 0 : i32
    %c0_i32_0 = arith.constant 0 : i32
    %c0_i32_1 = arith.constant 0 : i32
    return %c0_i32, %c0_i32_0 : i32, i32
  }
  func.func @transform_4(%arg0: i32) -> (i32, i32) {
    %c0_i32 = arith.constant 0 : i32
    %c0_i32_0 = arith.constant 0 : i32
    %c0_i32_1 = arith.constant 0 : i32
    return %c0_i32, %c0_i32_0 : i32, i32
  }
  func.func @transform_5(%arg0: i32) -> (i32, i32) {
    %c0_i32 = arith.constant 0 : i32
    %c0_i32_0 = arith.constant 0 : i32
    %c0_i32_1 = arith.constant 0 : i32
    return %c0_i32, %c0_i32_0 : i32, i32
  }
  func.func @transform_6(%arg0: i32) -> (i32, i32) {
    %c0_i32 = arith.constant 0 : i32
    %c0_i32_0 = arith.constant 0 : i32
    %c0_i32_1 = arith.constant 0 : i32
    return %c0_i32, %c0_i32_0 : i32, i32
  }
  func.func @transform_7(%arg0: i32) -> (i32, i32) {
    %c0_i32 = arith.constant 0 : i32
    %c0_i32_0 = arith.constant 0 : i32
    %c0_i32_1 = arith.constant 0 : i32
    return %c0_i32, %c0_i32_0 : i32, i32
  }
  func.func @transform_8(%arg0: i32) -> (i32, i32) {
    %c0_i32 = arith.constant 0 : i32
    %c0_i32_0 = arith.constant 0 : i32
    %c0_i32_1 = arith.constant 0 : i32
    return %c0_i32, %c0_i32_0 : i32, i32
  }
  func.func @transform_9(%arg0: i32) -> (i32, i32) {
    %c0_i32 = arith.constant 0 : i32
    %c0_i32_0 = arith.constant 0 : i32
    %c0_i32_1 = arith.constant 0 : i32
    return %c0_i32, %c0_i32_0 : i32, i32
  }
  func.func @transform_10(%arg0: i32) -> (i32, i32) {
    %c0_i32 = arith.constant 0 : i32
    %c0_i32_0 = arith.constant 0 : i32
    %c0_i32_1 = arith.constant 0 : i32
    return %c0_i32, %c0_i32_0 : i32, i32
  }
  func.func @transform_11(%arg0: i32) -> (i32, i32) {
    %c0_i32 = arith.constant 0 : i32
    %c0_i32_0 = arith.constant 0 : i32
    return %arg0, %c0_i32 : i32, i32
  }
}

</mosaic_0001>

<bundles_post_ra>
// kernel: tpu_custom_call.1
= control target key start
LH: loop header
LB: loop body
LE: loop exit
PB: predicated region body
PF: predicated region fallthrough
CT: control target
= control target key end

     0   :  { %16 = vsyncpa [#allocation3], 0  ;;  %s879_s0 = inlined_call_operand.vmem [shape: f32[16,32], index: 0, kind: input, shape index: {}]   ;;  %s880_s1 = inlined_call_operand.vmem [shape: bf16[32,32], index: 1, kind: input, shape index: {}]   ;;  %s881_s2 = inlined_call_operand.vmem [shape: bf16[32,32], index: 2, kind: input, shape index: {}]   ;;  %s882_s3 = inlined_call_operand.hbm [shape: bf16[32,32], index: 3, kind: input, shape index: {}]   ;;  %s883_s4 = inlined_call_operand.hbm [shape: bf16[32,32], index: 4, kind: input, shape index: {}]   ;;  %s884_s5 = inlined_call_operand.hbm [shape: bf16[32,64], index: 5, kind: input, shape index: {}]   ;;  %s885_s6 = inlined_call_operand.vmem [shape: f32[1,64], index: 6, kind: input, shape index: {}]   ;;  %s886_s7 = inlined_call_operand.vmem [shape: f32[1,64], index: 7, kind: input, shape index: {}]   ;;  %s887_s8 = inlined_call_operand.vmem [shape: bf16[64,32], index: 8, kind: input, shape index: {}]   ;;  %s888_s9 = inlined_call_operand.vmem [shape: f32[1,32], index: 9, kind: input, shape index: {}]   ;;  %s889_s10 = inlined_call_operand.vmem [shape: f32[16,4], index: 10, kind: input, shape index: {}]   ;;  %s890_s11 = inlined_call_operand.hbm [shape: f32[16,32], index: 11, kind: output, shape index: {}]  }
   0x1   :  { %17 = vsyncpa [#allocation6], 0 }
   0x2   :  { %18 = vsyncpa [#allocation4], 0  ;;  %s42_s19 = sshll.u32 %s883_s4, 4  ;;  %s725_s20 = smov [#allocation5]   ;;  %s43_s19 = int_to_ptr.hbm [resolvable:$true] %s42_s19 }
   0x3   :  { %s44_s21 = sshll.u32 %s725_s20, 4  ;;  %s29_s24 = sshll.u32 %s882_s3, 4  ;;  %s45_s21 = int_to_ptr.vmem [resolvable:$true] %s44_s21  ;;  %s30_s24 = int_to_ptr.hbm [resolvable:$true] %s29_s24 }
   0x4   :  { %s726_s25 = smov 64   ;;  %s727_s26 = smov 4  }
   0x5   :  { %50 = dma.hbm_to_vmem [thread:$0]  %s43_s19, 256, %s45_s21, [#allocation6], %s726_s25, %s726_s25, %s727_s26  }
   0x6   :  { %s728_s27 = smov [#allocation2]   ;;  %s55_s12 = sshll.u32 %s884_s5, 4  ;;  %s56_s12 = int_to_ptr.hbm [resolvable:$true] %s55_s12 }
   0x7   :  { %s31_s28 = sshll.u32 %s728_s27, 4  ;;  %s729_s4 = smov [#allocation7]   ;;  %s32_s28 = int_to_ptr.vmem [resolvable:$true] %s31_s28 }
   0x8   :  { %37 = dma.hbm_to_vmem [thread:$0]  %s30_s24, 256, %s32_s28, [#allocation3], %s726_s25, %s726_s25, %s727_s26  }
   0x9   :  { %s57_s13 = sshll.u32 %s729_s4, 4  ;;  %s58_s13 = int_to_ptr.vmem [resolvable:$true] %s57_s13 }
   0xa   :  { %63 = dma.hbm_to_vmem [thread:$0]  %s56_s12, 256, %s58_s13, [#allocation6], %s726_s25, %s726_s25, %s727_s26  }
   0xb   :  { %719 = dma.done.wait [#allocation3], 256  }
   0xc   :  { %720 = vsyncadd [#allocation3], 4294967040 }
   0xd   :  { %721 = dma.done.wait [#allocation6], 512  }
   0xe   :  { %722 = vsyncadd [#allocation6], 4294966784  ;;  %v583_v0 = vld [vmem:[%s881_s2 + $0x8] sm:$0xff]  ;;  %v582_v2 = vld [vmem:[%s881_s2] sm:$0xff]  ;;  %vm106_vm0 = vcmask 261120   ;;  %vm236_vm1 = vcmask 64512  }
   0xf   :  { %v581_v1 = vld [vmem:[%s880_s1 + $0x8] sm:$0xff]  ;;  %v580_v3 = vld [vmem:[%s880_s1] sm:$0xff]  ;;  %146 = vmatpush.bf16.msra.mxu1 %v583_v0  ;;  %v587_v35 = vld [vmem:[#allocation5 + $0x8] sm:$0xff]  ;;  %v730_v44 = vmov 1   ;;  %v731_v45 = vmov 0   ;;  %v732_v55 = vmov 2  }
  0x10   :  { %v821_v4 = vld [vmem:[%s879_s0] sm:$0xff]  ;;  %v826_v5 = vld [vmem:[%s879_s0 + $0x8] sm:$0xff]  ;;  %116 = vmatpush.bf16.msra.mxu0 %v581_v1  ;;  %v586_v36 = vld [vmem:[#allocation5] sm:$0xff]  ;;  %607 = vset.pattern.permute.xlu0 %v730_v44  ;;  %v733_v56 = vmov 3   ;;  %vm450_vm2 = vcmask 523264   ;;  %s498_s17 = sshll.u32 %s890_s11, 4  ;;  %s499_s17 = int_to_ptr.hbm [resolvable:$true] %s498_s17 }
  0x11   :  { %v89_v6 = vpack.c.bf16 %v826_v5, %v821_v4  ;;  %v585_v11 = vld [vmem:[#allocation2 + $0x8] sm:$0xff]  ;;  %v584_v12 = vld [vmem:[#allocation2] sm:$0xff]  ;;  %608 = vset.pattern.permute.xlu1 %v730_v44  ;;  %606 = vset.pattern.permute.xlu2 %v731_v45  ;;  %v593_v51 = vld [vmem:[%s887_s8 + $0x18] sm:$0xff]  ;;  %s736_s18 = smov 8  }
  0x12   :  { %176 = vmatpush.bf16.msra.mxu2 %v585_v11  ;;  %v589_v40 = vld [vmem:[#allocation7 + $0x8] sm:$0xff]  ;;  %v588_v41 = vld [vmem:[#allocation7] sm:$0xff]  ;;  %v592_v52 = vld [vmem:[%s887_s8 + $0x10] sm:$0xff] }
  0x13   :  { %147 = vmatpush.bf16.msra.mxu1 %v582_v2  ;;  %v341_v42 = vld [vmem:[%s889_s10] sm:$0xff]  ;;  %v342_v43 = vld [vmem:[%s889_s10 + $0x8] sm:$0xff] }
  0x14   :  { %117 = vmatpush.bf16.msra.mxu0 %v580_v3  ;;  %379 = vperm.xlu2 %606, %v341_v42   ;;  %v591_v53 = vld [vmem:[%s887_s8 + $0x8] sm:$0xff]  ;;  %v590_v54 = vld [vmem:[%s887_s8] sm:$0xff] }
  0x15   :  { %v612_v58 = vld [vmem:[%s885_s6] ss:$0 sm:$0xff] }
  0x16   :  { %529 = vmatmul.msk.bf16.vlgmr.msra.gmra.mxu1 %vm106_vm0, %v89_v6  ;;  %177 = vmatpush.bf16.msra.mxu2 %v584_v12  ;;  %v613_v0 = vld [vmem:[%s886_s7] ss:$0 sm:$0xff]  ;;  %s734_s7 = smov [#allocation8]  }
  0x17   :  { %520 = vmatmul.msk.bf16.vlgmr.msra.gmra.mxu0 %vm106_vm0, %v89_v6  ;;  %331 = vmatpush.bf16.msrb.mxu1 %v587_v35  ;;  %s496_s15 = sshll.u32 %s734_s7, 4  ;;  %s497_s15 = int_to_ptr.vmem [resolvable:$true] %s496_s15 }
  0x19   :  { %538 = vmatmul.msk.bf16.vlgmr.msra.gmra.mxu2 %vm106_vm0, %v89_v6 }
  0x1a   :  { %369 = vmatpush.bf16.msrb.mxu2 %v589_v40 }
  0x1b   :  { %332 = vmatpush.bf16.msrb.mxu1 %v586_v36 }
  0x1c   :  { %384 = vperm.xlu2 %606, %v342_v43  }
  0x1e   :  { %370 = vmatpush.bf16.msrb.mxu2 %v588_v41 }
  0x24   :  { %609 = vset.pattern.permute.xlu2 %v732_v55 }
  0x25   :  { %471 = vperm.xlu2 %609, %v341_v42  }
  0x2d   :  { %475 = vperm.xlu2 %609, %v342_v43  }
  0x35   :  { %610 = vset.pattern.permute.xlu2 %v733_v56 }
  0x36   :  { %481 = vperm.xlu2 %610, %v341_v42  }
  0x3e   :  { %485 = vperm.xlu2 %610, %v342_v43  }
  0x6e   :  { %v380_v57 = vpop.permute.xlu2 %379 }
  0x76   :  { %v385_v3 = vpop.permute.xlu2 %384 }
  0x7f   :  { %v472_v12 = vpop.permute.xlu2 %471 }
  0x93   :  { %v149_v7 = vpop.f32.mrf.mxu1 }
  0x94   :  { %539 = vmatpush.xpose.msk.msrb.mxu0 %vm106_vm0, %v149_v7  ;;  %v119_v8 = vpop.f32.mrf.mxu0 }
  0x97   :  { %540 = vmatmul.msk.f32.vlgmr.msrb.gmra.mxu0 %vm106_vm0, %v119_v8 }
  0x9b   :  { %v151_v9 = vpop.f32.mrf.mxu1 }
  0x9c   :  { %541 = vmatpush.xpose.msk.msra.mxu3 %vm106_vm0, %v151_v9  ;;  %v121_v10 = vpop.f32.mrf.mxu0  ;;  %v179_v27 = vpop.f32.mrf.mxu2 }
  0x9f   :  { %542 = vmatmul.msk.f32.vlgmr.msra.gmra.mxu3 %vm106_vm0, %v121_v10 }
  0xa0   :  { %277 = vmatpush.msrb.mxu3 %v179_v27 }
  0xa2   :  { %458 = vmatpush.bf16.msra.mxu3 %v593_v51 }
  0xa4   :  { %v181_v28 = vpop.f32.mrf.mxu2 }
  0xa5   :  { %300 = vmatpush.msra.mxu0 %v181_v28 }
  0xa6   :  { %459 = vmatpush.bf16.msra.mxu3 %v592_v52 }
  0xaa   :  { %460 = vmatpush.bf16.msra.mxu3 %v591_v53 }
  0xae   :  { %461 = vmatpush.bf16.msra.mxu3 %v590_v54 }
 0x114   :  { %v207_v13 = vpop.f32.mrf.mxu0 }
 0x115   :  { %v237_v14 = vsel %vm236_vm1, %v207_v13, -inf }
 0x116   :  { %238 = vmax.xlane.f32.xlu0 %v237_v14  ;;  %v614_v14 = vld [vmem:[%s888_s9] ss:$0 sm:$0xff]  ;;  %s735_s9 = smov 128  }
 0x122   :  { %v233_v15 = vpop.f32.mrf.mxu3 }
 0x123   :  { %v240_v16 = vsel %vm236_vm1, %v233_v15, -inf }
 0x124   :  { %241 = vmax.xlane.f32.xlu0 %v240_v16 }
 0x138   :  { %391 = vperm.xlu0 %607, %v341_v42  }
 0x140   :  { %611 = vset.pattern.permute.xlu0 %v733_v56 }
 0x189   :  { %v239_v17 = vpop.xlane.xlu0 %238 }
 0x18a   :  { %v243_v18 = vsub.f32 %v207_v13, %v239_v17  ;;  %v476_v13 = vpop.permute.xlu2 %475 }
 0x18c   :  { %v245_v19 = vmul.f32 1.442695, %v243_v18 }
 0x18e   :  { %615 = vpow2.f32 %v245_v19 }
 0x192   :  { %v482_v18 = vpop.permute.xlu2 %481 }
 0x194   :  { %v616_v20 = vpop.eup %615 }
 0x195   :  { %v249_v21 = vsel %vm236_vm1, %v616_v20, 0.0 }
 0x196   :  { %250 = vadd.xlane.f32.xlu1 %v249_v21 }
 0x197   :  { %v242_v22 = vpop.xlane.xlu0 %241 }
 0x198   :  { %v244_v23 = vsub.f32 %v233_v15, %v242_v22 }
 0x19a   :  { %v247_v24 = vmul.f32 1.442695, %v244_v23 }
 0x19c   :  { %617 = vpow2.f32 %v247_v24 }
 0x1a2   :  { %v618_v25 = vpop.eup %617 }
 0x1a3   :  { %v252_v26 = vsel %vm236_vm1, %v618_v25, 0.0 }
 0x1a4   :  { %253 = vadd.xlane.f32.xlu1 %v252_v26 }
 0x1aa   :  { %v392_v60 = vpop.permute.xlu0 %391 }
 0x1ab   :  { %v401_v62 = vmul.f32 %v612_v58, %v392_v60 }
 0x1bd   :  { %395 = vperm.xlu1 %608, %v342_v43  }
 0x209   :  { %v251_v29 = vpop.xlane.xlu1 %250 }
 0x20a   :  { %619 = vrcp.f32 %v251_v29 }
 0x210   :  { %v620_v30 = vpop.eup %619 }
 0x211   :  { %v257_v31 = vmul.f32 %v620_v30, %v616_v20 }
 0x213   :  { %543 = vmatmul.msk.f32.vlgmr.msrb.gmra.mxu3 %vm236_vm1, %v257_v31 }
 0x217   :  { %v254_v32 = vpop.xlane.xlu1 %253 }
 0x218   :  { %621 = vrcp.f32 %v254_v32 }
 0x21e   :  { %v622_v33 = vpop.eup %621 }
 0x21f   :  { %v258_v34 = vmul.f32 %v622_v33, %v618_v25  ;;  %v486_v25 = vpop.permute.xlu2 %485 }
 0x221   :  { %544 = vmatmul.msk.f32.vlgmr.msra.gmra.mxu0 %vm236_vm1, %v258_v34 }
 0x22f   :  { %v396_v63 = vpop.permute.xlu1 %395 }
 0x230   :  { %v402_v2 = vmul.f32 %v612_v58, %v396_v63 }
 0x296   :  { %v279_v37 = vpop.f32.mrf.mxu3 }
 0x29e   :  { %v302_v38 = vpop.f32.mrf.mxu0 }
 0x29f   :  { %v305_v39 = vpack.c.bf16 %v302_v38, %v279_v37 }
 0x2a1   :  { %553 = vmatmul.msk.bf16.vlgmr.msrb.gmra.mxu1 %vm106_vm0, %v305_v39 }
 0x31e   :  { %v334_v46 = vpop.f32.mrf.mxu1 }
 0x31f   :  { %v339_v48 = vadd.f32 %v334_v46, %v821_v4 }
 0x326   :  { %v336_v47 = vpop.f32.mrf.mxu1 }
 0x327   :  { %v340_v49 = vadd.f32 %v336_v47, %v826_v5 }
 0x329   :  { %v343_v50 = vpack.c.bf16 %v340_v49, %v339_v48 }
 0x32b   :  { %562 = vmatmul.msk.bf16.vlgmr.msrb.gmra.mxu2 %vm106_vm0, %v343_v50 }
 0x3ae   :  { %v372_v59 = vpop.f32.mrf.mxu2 }
 0x3af   :  { %v387_v61 = vmul.f32 %v380_v57, %v372_v59 }
 0x3b1   :  { %v403_v1 = vadd.f32 %v401_v62, %v387_v61 }
 0x3b3   :  { %v409_v6 = vadd.f32 %v613_v0, %v403_v1 }
 0x3b5   :  { %v411_v9 = vmax.f32 %v409_v6, 0.0 }
 0x3b6   :  { %v374_v4 = vpop.f32.mrf.mxu2 }
 0x3b7   :  { %v388_v5 = vmul.f32 %v385_v3, %v374_v4 }
 0x3b9   :  { %v404_v7 = vadd.f32 %v402_v2, %v388_v5 }
 0x3bb   :  { %v410_v8 = vadd.f32 %v613_v0, %v404_v7 }
 0x3bd   :  { %v412_v10 = vmax.f32 %v410_v8, 0.0 }
 0x3bf   :  { %v413_v11 = vpack.c.bf16 %v412_v10, %v411_v9 }
 0x3c1   :  { %579 = vmatmul.msk.bf16.vlgmr.msra.gmra.mxu3 %vm450_vm2, %v413_v11 }
 0x444   :  { %v463_v15 = vpop.f32.mrf.mxu3 }
 0x445   :  { %v464_v16 = vadd.f32 %v614_v14, %v463_v15 }
 0x447   :  { %v468_v17 = vadd.f32 %v464_v16, %v339_v48 }
 0x449   :  { %v478_v19 = vmul.f32 %v472_v12, %v468_v17 }
 0x44b   :  { %v488_v20 = vadd.f32 %v482_v18, %v478_v19 }
 0x44c   :  { %v465_v21 = vpop.f32.mrf.mxu3 }
 0x44d   :  { %490 = vst.msk [vmem:[#allocation8] sm:$0xff] %vm106_vm0, %v488_v20  ;;  %v466_v22 = vadd.f32 %v614_v14, %v465_v21 }
 0x44f   :  { %v469_v23 = vadd.f32 %v466_v22, %v340_v49 }
 0x451   :  { %v479_v24 = vmul.f32 %v476_v13, %v469_v23 }
 0x453   :  { %v489_v26 = vadd.f32 %v486_v25, %v479_v24 }
 0x455   :  { %491 = vst.msk [vmem:[#allocation8 + $0x8] sm:$0xff] %vm106_vm0, %v489_v26 }
 0x456   :  { %504 = dma.vmem_to_hbm [thread:$0]  %s497_s15, 256, %s499_s17, [#allocation4], %s735_s9, %s735_s9, %s736_s18  }
 0x457   :  { %723 = dma.done.wait [#allocation4], 256  }
 0x458   :  { %724 = vsyncadd [#allocation4], 4294967040 }
 0x459   :  { %509 = vsyncpa [#allocation3], 1 }
 0x45a   :  { %510 = vsyncpa [#allocation6], 1 }
 0x45b   :  { %511 = vsyncpa [#allocation4], 1 }

// kernel: tpu_custom_call.1
= control target key start
LH: loop header
LB: loop body
LE: loop exit
PB: predicated region body
PF: predicated region fallthrough
CT: control target
= control target key end

     0   :  { %16 = vsyncpa [#allocation3], 0  ;;  %s879_s0 = inlined_call_operand.vmem [shape: f32[16,32], index: 0, kind: input, shape index: {}]   ;;  %s880_s1 = inlined_call_operand.vmem [shape: bf16[32,32], index: 1, kind: input, shape index: {}]   ;;  %s881_s2 = inlined_call_operand.vmem [shape: bf16[32,32], index: 2, kind: input, shape index: {}]   ;;  %s882_s3 = inlined_call_operand.hbm [shape: bf16[32,32], index: 3, kind: input, shape index: {}]   ;;  %s883_s4 = inlined_call_operand.hbm [shape: bf16[32,32], index: 4, kind: input, shape index: {}]   ;;  %s884_s5 = inlined_call_operand.hbm [shape: bf16[32,64], index: 5, kind: input, shape index: {}]   ;;  %s885_s6 = inlined_call_operand.vmem [shape: f32[1,64], index: 6, kind: input, shape index: {}]   ;;  %s886_s7 = inlined_call_operand.vmem [shape: f32[1,64], index: 7, kind: input, shape index: {}]   ;;  %s887_s8 = inlined_call_operand.vmem [shape: bf16[64,32], index: 8, kind: input, shape index: {}]   ;;  %s888_s9 = inlined_call_operand.vmem [shape: f32[1,32], index: 9, kind: input, shape index: {}]   ;;  %s889_s10 = inlined_call_operand.vmem [shape: f32[16,4], index: 10, kind: input, shape index: {}]   ;;  %s890_s11 = inlined_call_operand.hbm [shape: f32[16,32], index: 11, kind: output, shape index: {}]  }
   0x1   :  { %17 = vsyncpa [#allocation6], 0 }
   0x2   :  { %18 = vsyncpa [#allocation4], 0  ;;  %s42_s19 = sshll.u32 %s883_s4, 4  ;;  %s725_s20 = smov [#allocation5]   ;;  %s43_s19 = int_to_ptr.hbm [resolvable:$true] %s42_s19 }
   0x3   :  { %s44_s21 = sshll.u32 %s725_s20, 4  ;;  %s29_s24 = sshll.u32 %s882_s3, 4  ;;  %s45_s21 = int_to_ptr.vmem [resolvable:$true] %s44_s21  ;;  %s30_s24 = int_to_ptr.hbm [resolvable:$true] %s29_s24 }
   0x4   :  { %s726_s25 = smov 64   ;;  %s727_s26 = smov 4  }
   0x5   :  { %50 = dma.hbm_to_vmem [thread:$0]  %s43_s19, 256, %s45_s21, [#allocation6], %s726_s25, %s726_s25, %s727_s26  }
   0x6   :  { %s728_s27 = smov [#allocation2]   ;;  %s55_s12 = sshll.u32 %s884_s5, 4  ;;  %s56_s12 = int_to_ptr.hbm [resolvable:$true] %s55_s12 }
   0x7   :  { %s31_s28 = sshll.u32 %s728_s27, 4  ;;  %s729_s4 = smov [#allocation7]   ;;  %s32_s28 = int_to_ptr.vmem [resolvable:$true] %s31_s28 }
   0x8   :  { %37 = dma.hbm_to_vmem [thread:$0]  %s30_s24, 256, %s32_s28, [#allocation3], %s726_s25, %s726_s25, %s727_s26  }
   0x9   :  { %s57_s13 = sshll.u32 %s729_s4, 4  ;;  %s58_s13 = int_to_ptr.vmem [resolvable:$true] %s57_s13 }
   0xa   :  { %63 = dma.hbm_to_vmem [thread:$0]  %s56_s12, 256, %s58_s13, [#allocation6], %s726_s25, %s726_s25, %s727_s26  }
   0xb   :  { %719 = dma.done.wait [#allocation3], 256  }
   0xc   :  { %720 = vsyncadd [#allocation3], 4294967040 }
   0xd   :  { %721 = dma.done.wait [#allocation6], 512  }
   0xe   :  { %722 = vsyncadd [#allocation6], 4294966784  ;;  %v583_v0 = vld [vmem:[%s881_s2 + $0x8] sm:$0xff]  ;;  %v582_v2 = vld [vmem:[%s881_s2] sm:$0xff]  ;;  %vm106_vm0 = vcmask 261120   ;;  %vm236_vm1 = vcmask 64512  }
   0xf   :  { %v581_v1 = vld [vmem:[%s880_s1 + $0x8] sm:$0xff]  ;;  %v580_v3 = vld [vmem:[%s880_s1] sm:$0xff]  ;;  %146 = vmatpush.bf16.msra.mxu1 %v583_v0  ;;  %v587_v35 = vld [vmem:[#allocation5 + $0x8] sm:$0xff]  ;;  %v730_v44 = vmov 1   ;;  %v731_v45 = vmov 0   ;;  %v732_v55 = vmov 2  }
  0x10   :  { %v821_v4 = vld [vmem:[%s879_s0] sm:$0xff]  ;;  %v826_v5 = vld [vmem:[%s879_s0 + $0x8] sm:$0xff]  ;;  %116 = vmatpush.bf16.msra.mxu0 %v581_v1  ;;  %v586_v36 = vld [vmem:[#allocation5] sm:$0xff]  ;;  %607 = vset.pattern.permute.xlu0 %v730_v44  ;;  %v733_v56 = vmov 3   ;;  %vm450_vm2 = vcmask 523264   ;;  %s498_s17 = sshll.u32 %s890_s11, 4  ;;  %s499_s17 = int_to_ptr.hbm [resolvable:$true] %s498_s17 }
  0x11   :  { %v89_v6 = vpack.c.bf16 %v826_v5, %v821_v4  ;;  %v585_v11 = vld [vmem:[#allocation2 + $0x8] sm:$0xff]  ;;  %v584_v12 = vld [vmem:[#allocation2] sm:$0xff]  ;;  %608 = vset.pattern.permute.xlu1 %v730_v44  ;;  %606 = vset.pattern.permute.xlu2 %v731_v45  ;;  %v593_v51 = vld [vmem:[%s887_s8 + $0x18] sm:$0xff]  ;;  %s736_s18 = smov 8  }
  0x12   :  { %176 = vmatpush.bf16.msra.mxu2 %v585_v11  ;;  %v589_v40 = vld [vmem:[#allocation7 + $0x8] sm:$0xff]  ;;  %v588_v41 = vld [vmem:[#allocation7] sm:$0xff]  ;;  %v592_v52 = vld [vmem:[%s887_s8 + $0x10] sm:$0xff] }
  0x13   :  { %147 = vmatpush.bf16.msra.mxu1 %v582_v2  ;;  %v341_v42 = vld [vmem:[%s889_s10] sm:$0xff]  ;;  %v342_v43 = vld [vmem:[%s889_s10 + $0x8] sm:$0xff] }
  0x14   :  { %117 = vmatpush.bf16.msra.mxu0 %v580_v3  ;;  %379 = vperm.xlu2 %606, %v341_v42   ;;  %v591_v53 = vld [vmem:[%s887_s8 + $0x8] sm:$0xff]  ;;  %v590_v54 = vld [vmem:[%s887_s8] sm:$0xff] }
  0x15   :  { %v612_v58 = vld [vmem:[%s885_s6] ss:$0 sm:$0xff] }
  0x16   :  { %529 = vmatmul.msk.bf16.vlgmr.msra.gmra.mxu1 %vm106_vm0, %v89_v6  ;;  %177 = vmatpush.bf16.msra.mxu2 %v584_v12  ;;  %v613_v0 = vld [vmem:[%s886_s7] ss:$0 sm:$0xff]  ;;  %s734_s7 = smov [#allocation8]  }
  0x17   :  { %520 = vmatmul.msk.bf16.vlgmr.msra.gmra.mxu0 %vm106_vm0, %v89_v6  ;;  %331 = vmatpush.bf16.msrb.mxu1 %v587_v35  ;;  %s496_s15 = sshll.u32 %s734_s7, 4  ;;  %s497_s15 = int_to_ptr.vmem [resolvable:$true] %s496_s15 }
  0x19   :  { %538 = vmatmul.msk.bf16.vlgmr.msra.gmra.mxu2 %vm106_vm0, %v89_v6 }
  0x1a   :  { %369 = vmatpush.bf16.msrb.mxu2 %v589_v40 }
  0x1b   :  { %332 = vmatpush.bf16.msrb.mxu1 %v586_v36 }
  0x1c   :  { %384 = vperm.xlu2 %606, %v342_v43  }
  0x1e   :  { %370 = vmatpush.bf16.msrb.mxu2 %v588_v41 }
  0x24   :  { %609 = vset.pattern.permute.xlu2 %v732_v55 }
  0x25   :  { %471 = vperm.xlu2 %609, %v341_v42  }
  0x2d   :  { %475 = vperm.xlu2 %609, %v342_v43  }
  0x35   :  { %610 = vset.pattern.permute.xlu2 %v733_v56 }
  0x36   :  { %481 = vperm.xlu2 %610, %v341_v42  }
  0x3e   :  { %485 = vperm.xlu2 %610, %v342_v43  }
  0x6e   :  { %v380_v57 = vpop.permute.xlu2 %379 }
  0x76   :  { %v385_v3 = vpop.permute.xlu2 %384 }
  0x7f   :  { %v472_v12 = vpop.permute.xlu2 %471 }
  0x93   :  { %v149_v7 = vpop.f32.mrf.mxu1 }
  0x94   :  { %539 = vmatpush.xpose.msk.msrb.mxu0 %vm106_vm0, %v149_v7  ;;  %v119_v8 = vpop.f32.mrf.mxu0 }
  0x97   :  { %540 = vmatmul.msk.f32.vlgmr.msrb.gmra.mxu0 %vm106_vm0, %v119_v8 }
  0x9b   :  { %v151_v9 = vpop.f32.mrf.mxu1 }
  0x9c   :  { %541 = vmatpush.xpose.msk.msra.mxu3 %vm106_vm0, %v151_v9  ;;  %v121_v10 = vpop.f32.mrf.mxu0  ;;  %v179_v27 = vpop.f32.mrf.mxu2 }
  0x9f   :  { %542 = vmatmul.msk.f32.vlgmr.msra.gmra.mxu3 %vm106_vm0, %v121_v10 }
  0xa0   :  { %277 = vmatpush.msrb.mxu3 %v179_v27 }
  0xa2   :  { %458 = vmatpush.bf16.msra.mxu3 %v593_v51 }
  0xa4   :  { %v181_v28 = vpop.f32.mrf.mxu2 }
  0xa5   :  { %300 = vmatpush.msra.mxu0 %v181_v28 }
  0xa6   :  { %459 = vmatpush.bf16.msra.mxu3 %v592_v52 }
  0xaa   :  { %460 = vmatpush.bf16.msra.mxu3 %v591_v53 }
  0xae   :  { %461 = vmatpush.bf16.msra.mxu3 %v590_v54 }
 0x114   :  { %v207_v13 = vpop.f32.mrf.mxu0 }
 0x115   :  { %v237_v14 = vsel %vm236_vm1, %v207_v13, -inf }
 0x116   :  { %238 = vmax.xlane.f32.xlu0 %v237_v14  ;;  %v614_v14 = vld [vmem:[%s888_s9] ss:$0 sm:$0xff]  ;;  %s735_s9 = smov 128  }
 0x122   :  { %v233_v15 = vpop.f32.mrf.mxu3 }
 0x123   :  { %v240_v16 = vsel %vm236_vm1, %v233_v15, -inf }
 0x124   :  { %241 = vmax.xlane.f32.xlu0 %v240_v16 }
 0x138   :  { %391 = vperm.xlu0 %607, %v341_v42  }
 0x140   :  { %611 = vset.pattern.permute.xlu0 %v733_v56 }
 0x189   :  { %v239_v17 = vpop.xlane.xlu0 %238 }
 0x18a   :  { %v243_v18 = vsub.f32 %v207_v13, %v239_v17  ;;  %v476_v13 = vpop.permute.xlu2 %475 }
 0x18c   :  { %v245_v19 = vmul.f32 1.442695, %v243_v18 }
 0x18e   :  { %615 = vpow2.f32 %v245_v19 }
 0x192   :  { %v482_v18 = vpop.permute.xlu2 %481 }
 0x194   :  { %v616_v20 = vpop.eup %615 }
 0x195   :  { %v249_v21 = vsel %vm236_vm1, %v616_v20, 0.0 }
 0x196   :  { %250 = vadd.xlane.f32.xlu1 %v249_v21 }
 0x197   :  { %v242_v22 = vpop.xlane.xlu0 %241 }
 0x198   :  { %v244_v23 = vsub.f32 %v233_v15, %v242_v22 }
 0x19a   :  { %v247_v24 = vmul.f32 1.442695, %v244_v23 }
 0x19c   :  { %617 = vpow2.f32 %v247_v24 }
 0x1a2   :  { %v618_v25 = vpop.eup %617 }
 0x1a3   :  { %v252_v26 = vsel %vm236_vm1, %v618_v25, 0.0 }
 0x1a4   :  { %253 = vadd.xlane.f32.xlu1 %v252_v26 }
 0x1aa   :  { %v392_v60 = vpop.permute.xlu0 %391 }
 0x1ab   :  { %v401_v62 = vmul.f32 %v612_v58, %v392_v60 }
 0x1bd   :  { %395 = vperm.xlu1 %608, %v342_v43  }
 0x209   :  { %v251_v29 = vpop.xlane.xlu1 %250 }
 0x20a   :  { %619 = vrcp.f32 %v251_v29 }
 0x210   :  { %v620_v30 = vpop.eup %619 }
 0x211   :  { %v257_v31 = vmul.f32 %v620_v30, %v616_v20 }
 0x213   :  { %543 = vmatmul.msk.f32.vlgmr.msrb.gmra.mxu3 %vm236_vm1, %v257_v31 }
 0x217   :  { %v254_v32 = vpop.xlane.xlu1 %253 }
 0x218   :  { %621 = vrcp.f32 %v254_v32 }
 0x21e   :  { %v622_v33 = vpop.eup %621 }
 0x21f   :  { %v258_v34 = vmul.f32 %v622_v33, %v618_v25  ;;  %v486_v25 = vpop.permute.xlu2 %485 }
 0x221   :  { %544 = vmatmul.msk.f32.vlgmr.msra.gmra.mxu0 %vm236_vm1, %v258_v34 }
 0x22f   :  { %v396_v63 = vpop.permute.xlu1 %395 }
 0x230   :  { %v402_v2 = vmul.f32 %v612_v58, %v396_v63 }
 0x296   :  { %v279_v37 = vpop.f32.mrf.mxu3 }
 0x29e   :  { %v302_v38 = vpop.f32.mrf.mxu0 }
 0x29f   :  { %v305_v39 = vpack.c.bf16 %v302_v38, %v279_v37 }
 0x2a1   :  { %553 = vmatmul.msk.bf16.vlgmr.msrb.gmra.mxu1 %vm106_vm0, %v305_v39 }
 0x31e   :  { %v334_v46 = vpop.f32.mrf.mxu1 }
 0x31f   :  { %v339_v48 = vadd.f32 %v334_v46, %v821_v4 }
 0x326   :  { %v336_v47 = vpop.f32.mrf.mxu1 }
 0x327   :  { %v340_v49 = vadd.f32 %v336_v47, %v826_v5 }
 0x329   :  { %v343_v50 = vpack.c.bf16 %v340_v49, %v339_v48 }
 0x32b   :  { %562 = vmatmul.msk.bf16.vlgmr.msrb.gmra.mxu2 %vm106_vm0, %v343_v50 }
 0x3ae   :  { %v372_v59 = vpop.f32.mrf.mxu2 }
 0x3af   :  { %v387_v61 = vmul.f32 %v380_v57, %v372_v59 }
 0x3b1   :  { %v403_v1 = vadd.f32 %v401_v62, %v387_v61 }
 0x3b3   :  { %v409_v6 = vadd.f32 %v613_v0, %v403_v1 }
 0x3b5   :  { %v411_v9 = vmax.f32 %v409_v6, 0.0 }
 0x3b6   :  { %v374_v4 = vpop.f32.mrf.mxu2 }
 0x3b7   :  { %v388_v5 = vmul.f32 %v385_v3, %v374_v4 }
 0x3b9   :  { %v404_v7 = vadd.f32 %v402_v2, %v388_v5 }
 0x3bb   :  { %v410_v8 = vadd.f32 %v613_v0, %v404_v7 }
 0x3bd   :  { %v412_v10 = vmax.f32 %v410_v8, 0.0 }
 0x3bf   :  { %v413_v11 = vpack.c.bf16 %v412_v10, %v411_v9 }
 0x3c1   :  { %579 = vmatmul.msk.bf16.vlgmr.msra.gmra.mxu3 %vm450_vm2, %v413_v11 }
 0x444   :  { %v463_v15 = vpop.f32.mrf.mxu3 }
 0x445   :  { %v464_v16 = vadd.f32 %v614_v14, %v463_v15 }
 0x447   :  { %v468_v17 = vadd.f32 %v464_v16, %v339_v48 }
 0x449   :  { %v478_v19 = vmul.f32 %v472_v12, %v468_v17 }
 0x44b   :  { %v488_v20 = vadd.f32 %v482_v18, %v478_v19 }
 0x44c   :  { %v465_v21 = vpop.f32.mrf.mxu3 }
 0x44d   :  { %490 = vst.msk [vmem:[#allocation8] sm:$0xff] %vm106_vm0, %v488_v20  ;;  %v466_v22 = vadd.f32 %v614_v14, %v465_v21 }
 0x44f   :  { %v469_v23 = vadd.f32 %v466_v22, %v340_v49 }
 0x451   :  { %v479_v24 = vmul.f32 %v476_v13, %v469_v23 }
 0x453   :  { %v489_v26 = vadd.f32 %v486_v25, %v479_v24 }
 0x455   :  { %491 = vst.msk [vmem:[#allocation8 + $0x8] sm:$0xff] %vm106_vm0, %v489_v26 }
 0x456   :  { %504 = dma.vmem_to_hbm [thread:$0]  %s497_s15, 256, %s499_s17, [#allocation4], %s735_s9, %s735_s9, %s736_s18  }
 0x457   :  { %723 = dma.done.wait [#allocation4], 256  }
 0x458   :  { %724 = vsyncadd [#allocation4], 4294967040 }
 0x459   :  { %509 = vsyncpa [#allocation3], 1 }
 0x45a   :  { %510 = vsyncpa [#allocation6], 1 }
 0x45b   :  { %511 = vsyncpa [#allocation4], 1 }

</bundles_post_ra>
